<compile_context>
chip_gen: v6e
topology: v6e:2x2x1
jax: 0.10.0
libtpu: 0.0.40
codegen_flags: <defaults>
</compile_context>

<pallas_src>
import functools

import jax
import jax.numpy as jnp
from jax.experimental import pallas as pl
from jax.experimental.pallas import tpu as pltpu


def _round_up(a, m):
    return (a + m - 1) // m * m


# ---------------------------------------------------------------------------
# Fused kernel: per-sample depthwise-noise conv ('same') + standard conv (+bias)
# ---------------------------------------------------------------------------
def _fused_sto_conv_kernel(x_ref, noise_ref, w_ref, out_ref, dw_ref, stack_ref, *,
                           C, kh, kw, Wp, Sdw_pad, Sout_pad, K, Bt):
    """One grid step = one batch tile of Bt samples.

    x_ref     : (Bt, C, Sx_pad)    zero-padded samples, flattened row-major, stride Wp
    noise_ref : (Bt, C, kh*kw)     per-sample depthwise filters (sampled noise)
    w_ref     : (Np, Kp)           repacked weight (+ bias column), K = kh*kw*C (+1)
    out_ref   : (Bt, Np, Sout_pad) output, channel-major, flattened at stride Wp
    dw_ref    : (C, Sdw_pad)       VMEM scratch: depthwise result of the current sample
    stack_ref : (Kp, Sout_pad)     VMEM scratch: stacked shifted dw windows (dot RHS)
    """
    f32 = jnp.float32
    KK = kh * kw
    Kp = stack_ref.shape[0]

    # Constant rows of the stacked RHS: a ones row (folds the bias into the MXU dot)
    # and a zero tail (padded K rows matched by zero weight columns). Re-written every
    # grid step (tiny) so it is safe under megacore grid partitioning.
    stack_ref[K:K + 1, :] = jnp.ones((1, Sout_pad), f32)
    if Kp > K + 1:
        stack_ref[K + 1:Kp, :] = jnp.zeros((Kp - K - 1, Sout_pad), f32)

    def sample_body(i, carry):
        xs = x_ref[i].astype(f32)           # (C, Sx_pad) — loaded once, reused per tap
        nz = noise_ref[i].astype(f32)       # (C, kh*kw)

        # ---- Stage A: per-channel 'same' depthwise conv with the sampled filter. ----
        # dw[c, a*Wp + b] = sum_{dy,dx} noise[c,dy,dx] * xpad[c, a+dy, b+dx]
        dw = xs[:, 0:Sdw_pad] * nz[:, 0:1]
        for t in range(1, KK):
            dy, dx = divmod(t, kw)
            shift = dy * Wp + dx
            dw = dw + xs[:, shift:shift + Sdw_pad] * nz[:, t:t + 1]
        dw_ref[...] = dw

        # ---- Stage B: stack the kh*kw shifted windows -> ONE MXU dot (K = kh*kw*C+1). --
        for t in range(KK):
            dy, dx = divmod(t, kw)
            shift = dy * Wp + dx
            stack_ref[t * C:(t + 1) * C, :] = dw_ref[:, shift:shift + Sout_pad]
        acc = jnp.dot(w_ref[...], stack_ref[...],
                      preferred_element_type=jnp.float32)       # (Np, Sout_pad), bias folded
        out_ref[i] = acc.astype(out_ref.dtype)
        return carry

    jax.lax.fori_loop(0, Bt, sample_body, 0, unroll=True)


# ---------------------------------------------------------------------------
# Host-side helpers (noise sampling, geometry, weight repack, batch-tile choice)
# ---------------------------------------------------------------------------
def sample_kernel_noise(post_mean, post_std, indices, eps_key):
    """get_noise(stochastic_mode=1) for mode='kernel': (B, Cin, kh, kw)."""
    mean = post_mean[indices].astype(jnp.float32)
    std = jax.nn.softplus(post_std.astype(jnp.float32))[indices]
    eps = jax.random.normal(eps_key, mean.shape, dtype=jnp.float32)
    return mean + std * eps


def _choose_batch_tile(B, per_sample_bytes):
    """Batch-tile size from per-generation VMEM (v7x: 64 MiB, v5e/v6e: 128 MiB)."""
    try:
        vmem_bytes = int(pltpu.get_tpu_info().vmem_capacity_bytes)
    except Exception:  # pragma: no cover - conservative fallback (v7x floor)
        vmem_bytes = 64 << 20
    budget = vmem_bytes // 8            # headroom for weights, scratch, compiler scratch
    bt = max(1, min(B, budget // max(per_sample_bytes, 1)))
    if B >= 2:
        bt = min(bt, -(-B // 2))        # >= 2 grid steps so both v7x TensorCores get work
    return bt


def sto_conv2d_forward(x, indices, weight, bias, post_mean, post_std, eps_key,
                       stride=1, padding=0):
    """StoConv2d.forward (mode='kernel', stochastic=1), fused Pallas kernel."""
    if stride != 1 or padding != 0:
        # TODO(synk): only the module defaults (stride=1, padding=0) of the outer conv
        # are implemented by the fused kernel.
        raise NotImplementedError("fused StoConv2d kernel supports stride=1, padding=0")

    B, C, H, W = x.shape
    Cout, Cin, kh, kw = weight.shape
    assert Cin == C
    # 'same' split below matches PyTorch's padding='same' only for odd kernel sizes.
    assert kh % 2 == 1 and kw % 2 == 1, "only odd kernel sizes supported"

    # get_noise (tiny elementwise op, stays in JAX)
    noise = sample_kernel_noise(post_mean, post_std, indices, eps_key)     # (B, C, kh, kw)
    noise = noise.reshape(B, C, kh * kw)

    # Geometry (flattened row-major at stride Wp, lane dims padded lane-dense).
    ph0 = (kh - 1) // 2
    pw0, pw1 = (kw - 1) // 2, (kw - 1) - (kw - 1) // 2
    Wp = W + kw - 1
    OH, OW = H - kh + 1, W - kw + 1
    max_shift = (kh - 1) * Wp + (kw - 1)
    Sout = OH * Wp
    Sout_pad = _round_up(Sout, 128)                   # unmasked full-lane output stores
    Sdw_pad = _round_up(max_shift + Sout_pad, 128)    # depthwise scratch lane extent
    Sx_req = max_shift + Sdw_pad                      # lanes Stage A needs from the input
    Hp2 = -(-Sx_req // Wp)                            # rows so ONE spatial pad covers it
    Sx_pad = Hp2 * Wp

    # ONE pad pass: 'same' spatial pad + flattening tail rows, then flatten.
    x_flat = jnp.pad(x, ((0, 0), (0, 0), (ph0, Hp2 - H - ph0), (pw0, pw1)))
    x_flat = x_flat.reshape(B, C, Sx_pad)

    # Weight repack: (Cout, C, kh, kw) -> (Np, Kp) with K ordered (tap-major, channel
    # within tap) to match the stacked RHS, plus a trailing bias column.
    K = kh * kw * C
    Np = _round_up(Cout, 8)
    Kp = _round_up(K + 1, 8)   # TODO(synk): pad to 128 (v5e) / 256 (v6e, v7x) for real C
    w_flat = weight.transpose(0, 2, 3, 1).reshape(Cout, K).astype(jnp.float32)
    w_aug = jnp.concatenate([w_flat, bias.reshape(Cout, 1).astype(jnp.float32)], axis=1)
    w_pack = jnp.pad(w_aug, ((0, Np - Cout), (0, Kp - (K + 1))))

    # Batch tile: size the per-step DMA tiles from VMEM headroom (double-buffered).
    itemsize = jnp.dtype(x.dtype).itemsize
    per_sample_bytes = 2 * (itemsize * C * Sx_pad + 4 * C * kh * kw
                            + itemsize * Np * Sout_pad)
    Bt = _choose_batch_tile(B, per_sample_bytes)
    Bpad = _round_up(B, Bt)
    if Bpad != B:
        x_flat = jnp.pad(x_flat, ((0, Bpad - B), (0, 0), (0, 0)))
        noise = jnp.pad(noise, ((0, Bpad - B), (0, 0), (0, 0)))

    kernel = functools.partial(_fused_sto_conv_kernel, C=C, kh=kh, kw=kw, Wp=Wp,
                               Sdw_pad=Sdw_pad, Sout_pad=Sout_pad, K=K, Bt=Bt)

    grid_spec = pltpu.PrefetchScalarGridSpec(
        num_scalar_prefetch=0,
        grid=(Bpad // Bt,),
        in_specs=[
            pl.BlockSpec((Bt, C, Sx_pad), lambda b: (b, 0, 0)),
            pl.BlockSpec((Bt, C, kh * kw), lambda b: (b, 0, 0)),
            pl.BlockSpec((Np, Kp), lambda b: (0, 0)),
        ],
        out_specs=pl.BlockSpec((Bt, Np, Sout_pad), lambda b: (b, 0, 0)),
        scratch_shapes=[
            pltpu.VMEM((C, Sdw_pad), jnp.float32),       # depthwise result (per sample)
            pltpu.VMEM((Kp, Sout_pad), jnp.float32),     # stacked dot RHS (per sample)
        ],
    )

    out = pl.pallas_call(
        kernel,
        out_shape=jax.ShapeDtypeStruct((Bpad, Np, Sout_pad), x.dtype),
        grid_spec=grid_spec,
        compiler_params=pltpu.CompilerParams(dimension_semantics=("parallel",)),
    )(x_flat, noise, w_pack)

    # Output is already channel-major: drop padding and un-flatten (no transpose).
    out = out[:B, :Cout, :Sout].reshape(B, Cout, OH, Wp)[:, :, :, :OW]
    return out


# ---------------------------------------------------------------------------
# Plain-JAX reference (for the numerical self-check; pure f32 VPU math, no MXU)
# ---------------------------------------------------------------------------
def _reference_sto_conv2d(x, noise4, weight, bias):
    B, C, H, W = x.shape
    Cout = weight.shape[0]
    kh, kw = noise4.shape[2], noise4.shape[3]
    ph0, ph1 = (kh - 1) // 2, (kh - 1) - (kh - 1) // 2
    pw0, pw1 = (kw - 1) // 2, (kw - 1) - (kw - 1) // 2
    xp = jnp.pad(x, ((0, 0), (0, 0), (ph0, ph1), (pw0, pw1))).astype(jnp.float32)
    dw = jnp.zeros((B, C, H, W), jnp.float32)
    for dy in range(kh):
        for dx in range(kw):
            dw = dw + xp[:, :, dy:dy + H, dx:dx + W] * noise4[:, :, dy, dx][:, :, None, None]
    OH, OW = H - kh + 1, W - kw + 1
    out = jnp.zeros((B, Cout, OH, OW), jnp.float32)
    for dy in range(kh):
        for dx in range(kw):
            patch = dw[:, :, dy:dy + OH, dx:dx + OW]                 # (B, C, OH, OW)
            w_t = weight[:, :, dy, dx].astype(jnp.float32)           # (Cout, C)
            out = out + (patch[:, None] * w_t[None, :, :, None, None]).sum(axis=2)
    return out + bias[None, :, None, None].astype(jnp.float32)


if __name__ == "__main__":
    # Small deterministic config (module defaults: stride=1, padding=0, bias=True,
    # n_components=4, post_mean_init=(1.0, 0.05), post_std_init=(0.4, 0.02)).
    B, Cin, Cout, H, W, ksz = 2, 4, 8, 16, 16, 3
    n_components = 4

    root = jax.random.PRNGKey(0)
    k_x, k_w, k_b, k_pm, k_ps, k_eps = jax.random.split(root, 6)

    x = jax.random.normal(k_x, (B, Cin, H, W), jnp.float32)
    indices = jnp.arange(B) % n_components

    weight = 0.1 * jax.random.normal(k_w, (Cout, Cin, ksz, ksz), jnp.float32)
    bias = 0.1 * jax.random.normal(k_b, (Cout,), jnp.float32)
    post_mean = 1.0 + 0.05 * jax.random.normal(k_pm, (n_components, Cin, ksz, ksz), jnp.float32)
    post_std = 0.4 + 0.02 * jax.random.normal(k_ps, (n_components, Cin, ksz, ksz), jnp.float32)

    fwd = jax.jit(sto_conv2d_forward)
    out = jax.block_until_ready(fwd(x, indices, weight, bias, post_mean, post_std, k_eps))
    assert out.shape == (B, Cout, H - ksz + 1, W - ksz + 1), out.shape

    # Numerical self-check against a plain-JAX reference (same sampled noise).
    noise4 = sample_kernel_noise(post_mean, post_std, indices, k_eps)
    ref = _reference_sto_conv2d(x, noise4, weight, bias)
    max_err = float(jnp.max(jnp.abs(out.astype(jnp.float32) - ref)))
    assert max_err < 2e-4, max_err

    print("KERNEL_OK")
</pallas_src>

<mosaic_0001>
module attributes {stable_mosaic.version = 11 : i64} {
  func.func @_fused_sto_conv_kernel(%arg0: i32, %arg1: memref<1x4x432xf32, #tpu.memory_space<vmem>>, %arg2: memref<1x4x9xf32, #tpu.memory_space<vmem>>, %arg3: memref<8x40xf32, #tpu.memory_space<vmem>>, %arg4: memref<1x8x256xf32, #tpu.memory_space<vmem>>, %arg5: memref<4x384xf32, #tpu.memory_space<vmem>>, %arg6: memref<40x256xf32, #tpu.memory_space<vmem>>) attributes {dimension_semantics = [#tpu.dimension_semantics<parallel>], iteration_bounds = array<i64: 2>, scalar_prefetch = 0 : i64, scratch_operands = 2 : i64, tpu.core_type = #tpu.core_type<tc>, window_params = [{transform_indices = @transform_0, window_bounds = array<i64: 1, 4, 432>}, {transform_indices = @transform_1, window_bounds = array<i64: 1, 4, 9>}, {pipeline_mode = #tpu.pipeline_mode<synchronous>, transform_indices = @transform_2, window_bounds = array<i64: 8, 40>}, {transform_indices = @transform_3, window_bounds = array<i64: 1, 8, 256>}]} {
    %cst = arith.constant 1.000000e+00 : f32
    %0 = vector.broadcast %cst : f32 to vector<1x256xf32>
    %c36 = arith.constant 36 : index
    %c0 = arith.constant 0 : index
    %1 = vector.load %arg6[%c36, %c0] : memref<40x256xf32, #tpu.memory_space<vmem>>, vector<1x256xf32>
    tpu.vector_store %arg6[%c36, %c0], %0 {strides = array<i32>} : memref<40x256xf32, #tpu.memory_space<vmem>>, vector<1x256xf32>,
    %cst_0 = arith.constant 0.000000e+00 : f32
    %2 = vector.broadcast %cst_0 : f32 to vector<3x256xf32>
    %c37 = arith.constant 37 : index
    %c0_1 = arith.constant 0 : index
    %3 = vector.load %arg6[%c37, %c0_1] : memref<40x256xf32, #tpu.memory_space<vmem>>, vector<3x256xf32>
    tpu.vector_store %arg6[%c37, %c0_1], %2 {strides = array<i32>} : memref<40x256xf32, #tpu.memory_space<vmem>>, vector<3x256xf32>,
    %c0_i32 = arith.constant 0 : i32
    %4 = arith.index_cast %c0_i32 : i32 to index
    %c0_2 = arith.constant 0 : index
    %c0_3 = arith.constant 0 : index
    %5 = vector.load %arg1[%4, %c0_2, %c0_3] : memref<1x4x432xf32, #tpu.memory_space<vmem>>, vector<1x4x432xf32>
    %6 = vector.shape_cast %5 : vector<1x4x432xf32> to vector<4x432xf32>
    %7 = arith.index_cast %c0_i32 : i32 to index
    %c0_4 = arith.constant 0 : index
    %c0_5 = arith.constant 0 : index
    %8 = vector.load %arg2[%7, %c0_4, %c0_5] : memref<1x4x9xf32, #tpu.memory_space<vmem>>, vector<1x4x9xf32>
    %9 = vector.shape_cast %8 : vector<1x4x9xf32> to vector<4x9xf32>
    %10 = vector.extract_strided_slice %6 {offsets = [0, 0], sizes = [4, 384], strides = [1, 1]} : vector<4x432xf32> to vector<4x384xf32>
    %11 = vector.extract_strided_slice %9 {offsets = [0, 0], sizes = [4, 1], strides = [1, 1]} : vector<4x9xf32> to vector<4x1xf32>
    %12 = vector.broadcast %11 : vector<4x1xf32> to vector<4x384xf32>
    %13 = arith.mulf %10, %12 : vector<4x384xf32>
    %14 = vector.extract_strided_slice %6 {offsets = [0, 1], sizes = [4, 384], strides = [1, 1]} : vector<4x432xf32> to vector<4x384xf32>
    %15 = vector.extract_strided_slice %9 {offsets = [0, 1], sizes = [4, 1], strides = [1, 1]} : vector<4x9xf32> to vector<4x1xf32>
    %16 = vector.broadcast %15 : vector<4x1xf32> to vector<4x384xf32>
    %17 = arith.mulf %14, %16 : vector<4x384xf32>
    %18 = arith.addf %13, %17 : vector<4x384xf32>
    %19 = vector.extract_strided_slice %6 {offsets = [0, 2], sizes = [4, 384], strides = [1, 1]} : vector<4x432xf32> to vector<4x384xf32>
    %20 = vector.extract_strided_slice %9 {offsets = [0, 2], sizes = [4, 1], strides = [1, 1]} : vector<4x9xf32> to vector<4x1xf32>
    %21 = vector.broadcast %20 : vector<4x1xf32> to vector<4x384xf32>
    %22 = arith.mulf %19, %21 : vector<4x384xf32>
    %23 = arith.addf %18, %22 : vector<4x384xf32>
    %24 = vector.extract_strided_slice %6 {offsets = [0, 18], sizes = [4, 384], strides = [1, 1]} : vector<4x432xf32> to vector<4x384xf32>
    %25 = vector.extract_strided_slice %9 {offsets = [0, 3], sizes = [4, 1], strides = [1, 1]} : vector<4x9xf32> to vector<4x1xf32>
    %26 = vector.broadcast %25 : vector<4x1xf32> to vector<4x384xf32>
    %27 = arith.mulf %24, %26 : vector<4x384xf32>
    %28 = arith.addf %23, %27 : vector<4x384xf32>
    %29 = vector.extract_strided_slice %6 {offsets = [0, 19], sizes = [4, 384], strides = [1, 1]} : vector<4x432xf32> to vector<4x384xf32>
    %30 = vector.extract_strided_slice %9 {offsets = [0, 4], sizes = [4, 1], strides = [1, 1]} : vector<4x9xf32> to vector<4x1xf32>
    %31 = vector.broadcast %30 : vector<4x1xf32> to vector<4x384xf32>
    %32 = arith.mulf %29, %31 : vector<4x384xf32>
    %33 = arith.addf %28, %32 : vector<4x384xf32>
    %34 = vector.extract_strided_slice %6 {offsets = [0, 20], sizes = [4, 384], strides = [1, 1]} : vector<4x432xf32> to vector<4x384xf32>
    %35 = vector.extract_strided_slice %9 {offsets = [0, 5], sizes = [4, 1], strides = [1, 1]} : vector<4x9xf32> to vector<4x1xf32>
    %36 = vector.broadcast %35 : vector<4x1xf32> to vector<4x384xf32>
    %37 = arith.mulf %34, %36 : vector<4x384xf32>
    %38 = arith.addf %33, %37 : vector<4x384xf32>
    %39 = vector.extract_strided_slice %6 {offsets = [0, 36], sizes = [4, 384], strides = [1, 1]} : vector<4x432xf32> to vector<4x384xf32>
    %40 = vector.extract_strided_slice %9 {offsets = [0, 6], sizes = [4, 1], strides = [1, 1]} : vector<4x9xf32> to vector<4x1xf32>
    %41 = vector.broadcast %40 : vector<4x1xf32> to vector<4x384xf32>
    %42 = arith.mulf %39, %41 : vector<4x384xf32>
    %43 = arith.addf %38, %42 : vector<4x384xf32>
    %44 = vector.extract_strided_slice %6 {offsets = [0, 37], sizes = [4, 384], strides = [1, 1]} : vector<4x432xf32> to vector<4x384xf32>
    %45 = vector.extract_strided_slice %9 {offsets = [0, 7], sizes = [4, 1], strides = [1, 1]} : vector<4x9xf32> to vector<4x1xf32>
    %46 = vector.broadcast %45 : vector<4x1xf32> to vector<4x384xf32>
    %47 = arith.mulf %44, %46 : vector<4x384xf32>
    %48 = arith.addf %43, %47 : vector<4x384xf32>
    %49 = vector.extract_strided_slice %6 {offsets = [0, 38], sizes = [4, 384], strides = [1, 1]} : vector<4x432xf32> to vector<4x384xf32>
    %50 = vector.extract_strided_slice %9 {offsets = [0, 8], sizes = [4, 1], strides = [1, 1]} : vector<4x9xf32> to vector<4x1xf32>
    %51 = vector.broadcast %50 : vector<4x1xf32> to vector<4x384xf32>
    %52 = arith.mulf %49, %51 : vector<4x384xf32>
    %53 = arith.addf %48, %52 : vector<4x384xf32>
    %c0_6 = arith.constant 0 : index
    %c0_7 = arith.constant 0 : index
    %54 = vector.load %arg5[%c0_6, %c0_7] : memref<4x384xf32, #tpu.memory_space<vmem>>, vector<4x384xf32>
    tpu.vector_store %arg5[%c0_6, %c0_7], %53 {strides = array<i32>} : memref<4x384xf32, #tpu.memory_space<vmem>>, vector<4x384xf32>,
    %c0_8 = arith.constant 0 : index
    %c0_9 = arith.constant 0 : index
    %55 = vector.load %arg5[%c0_8, %c0_9] : memref<4x384xf32, #tpu.memory_space<vmem>>, vector<4x256xf32>
    %c0_10 = arith.constant 0 : index
    %c0_11 = arith.constant 0 : index
    %56 = vector.load %arg6[%c0_10, %c0_11] : memref<40x256xf32, #tpu.memory_space<vmem>>, vector<4x256xf32>
    tpu.vector_store %arg6[%c0_10, %c0_11], %55 {strides = array<i32>} : memref<40x256xf32, #tpu.memory_space<vmem>>, vector<4x256xf32>,
    %c0_12 = arith.constant 0 : index
    %c1 = arith.constant 1 : index
    %57 = vector.load %arg5[%c0_12, %c1] : memref<4x384xf32, #tpu.memory_space<vmem>>, vector<4x256xf32>
    %c4 = arith.constant 4 : index
    %c0_13 = arith.constant 0 : index
    %58 = vector.load %arg6[%c4, %c0_13] : memref<40x256xf32, #tpu.memory_space<vmem>>, vector<4x256xf32>
    tpu.vector_store %arg6[%c4, %c0_13], %57 {strides = array<i32>} : memref<40x256xf32, #tpu.memory_space<vmem>>, vector<4x256xf32>,
    %c0_14 = arith.constant 0 : index
    %c2 = arith.constant 2 : index
    %59 = vector.load %arg5[%c0_14, %c2] : memref<4x384xf32, #tpu.memory_space<vmem>>, vector<4x256xf32>
    %c8 = arith.constant 8 : index
    %c0_15 = arith.constant 0 : index
    %60 = vector.load %arg6[%c8, %c0_15] : memref<40x256xf32, #tpu.memory_space<vmem>>, vector<4x256xf32>
    tpu.vector_store %arg6[%c8, %c0_15], %59 {strides = array<i32>} : memref<40x256xf32, #tpu.memory_space<vmem>>, vector<4x256xf32>,
    %c0_16 = arith.constant 0 : index
    %c18 = arith.constant 18 : index
    %61 = vector.load %arg5[%c0_16, %c18] : memref<4x384xf32, #tpu.memory_space<vmem>>, vector<4x256xf32>
    %c12 = arith.constant 12 : index
    %c0_17 = arith.constant 0 : index
    %62 = vector.load %arg6[%c12, %c0_17] : memref<40x256xf32, #tpu.memory_space<vmem>>, vector<4x256xf32>
    tpu.vector_store %arg6[%c12, %c0_17], %61 {strides = array<i32>} : memref<40x256xf32, #tpu.memory_space<vmem>>, vector<4x256xf32>,
    %c0_18 = arith.constant 0 : index
    %c19 = arith.constant 19 : index
    %63 = vector.load %arg5[%c0_18, %c19] : memref<4x384xf32, #tpu.memory_space<vmem>>, vector<4x256xf32>
    %c16 = arith.constant 16 : index
    %c0_19 = arith.constant 0 : index
    %64 = vector.load %arg6[%c16, %c0_19] : memref<40x256xf32, #tpu.memory_space<vmem>>, vector<4x256xf32>
    tpu.vector_store %arg6[%c16, %c0_19], %63 {strides = array<i32>} : memref<40x256xf32, #tpu.memory_space<vmem>>, vector<4x256xf32>,
    %c0_20 = arith.constant 0 : index
    %c20 = arith.constant 20 : index
    %65 = vector.load %arg5[%c0_20, %c20] : memref<4x384xf32, #tpu.memory_space<vmem>>, vector<4x256xf32>
    %c20_21 = arith.constant 20 : index
    %c0_22 = arith.constant 0 : index
    %66 = vector.load %arg6[%c20_21, %c0_22] : memref<40x256xf32, #tpu.memory_space<vmem>>, vector<4x256xf32>
    tpu.vector_store %arg6[%c20_21, %c0_22], %65 {strides = array<i32>} : memref<40x256xf32, #tpu.memory_space<vmem>>, vector<4x256xf32>,
    %c0_23 = arith.constant 0 : index
    %c36_24 = arith.constant 36 : index
    %67 = vector.load %arg5[%c0_23, %c36_24] : memref<4x384xf32, #tpu.memory_space<vmem>>, vector<4x256xf32>
    %c24 = arith.constant 24 : index
    %c0_25 = arith.constant 0 : index
    %68 = vector.load %arg6[%c24, %c0_25] : memref<40x256xf32, #tpu.memory_space<vmem>>, vector<4x256xf32>
    tpu.vector_store %arg6[%c24, %c0_25], %67 {strides = array<i32>} : memref<40x256xf32, #tpu.memory_space<vmem>>, vector<4x256xf32>,
    %c0_26 = arith.constant 0 : index
    %c37_27 = arith.constant 37 : index
    %69 = vector.load %arg5[%c0_26, %c37_27] : memref<4x384xf32, #tpu.memory_space<vmem>>, vector<4x256xf32>
    %c28 = arith.constant 28 : index
    %c0_28 = arith.constant 0 : index
    %70 = vector.load %arg6[%c28, %c0_28] : memref<40x256xf32, #tpu.memory_space<vmem>>, vector<4x256xf32>
    tpu.vector_store %arg6[%c28, %c0_28], %69 {strides = array<i32>} : memref<40x256xf32, #tpu.memory_space<vmem>>, vector<4x256xf32>,
    %c0_29 = arith.constant 0 : index
    %c38 = arith.constant 38 : index
    %71 = vector.load %arg5[%c0_29, %c38] : memref<4x384xf32, #tpu.memory_space<vmem>>, vector<4x256xf32>
    %c32 = arith.constant 32 : index
    %c0_30 = arith.constant 0 : index
    %72 = vector.load %arg6[%c32, %c0_30] : memref<40x256xf32, #tpu.memory_space<vmem>>, vector<4x256xf32>
    tpu.vector_store %arg6[%c32, %c0_30], %71 {strides = array<i32>} : memref<40x256xf32, #tpu.memory_space<vmem>>, vector<4x256xf32>,
    %c0_31 = arith.constant 0 : index
    %c0_32 = arith.constant 0 : index
    %73 = vector.load %arg3[%c0_31, %c0_32] : memref<8x40xf32, #tpu.memory_space<vmem>>, vector<8x40xf32>
    %c0_33 = arith.constant 0 : index
    %c0_34 = arith.constant 0 : index
    %74 = vector.load %arg6[%c0_33, %c0_34] : memref<40x256xf32, #tpu.memory_space<vmem>>, vector<40x256xf32>
    %cst_35 = arith.constant dense<0.000000e+00> : vector<8x256xf32>
    %75 = tpu.matmul %73, %74, %cst_35 {dimension_numbers = #tpu.dot_dimension_numbers<[1], [0], [0], [1], [0, 0, 1, 1], [], []>} : vector<8x40xf32>, vector<40x256xf32>, vector<8x256xf32> -> vector<8x256xf32>
    %76 = arith.index_cast %c0_i32 : i32 to index
    %c0_36 = arith.constant 0 : index
    %c0_37 = arith.constant 0 : index
    %77 = vector.load %arg4[%76, %c0_36, %c0_37] : memref<1x8x256xf32, #tpu.memory_space<vmem>>, vector<1x8x256xf32>
    %78 = vector.shape_cast %77 : vector<1x8x256xf32> to vector<8x256xf32>
    %79 = vector.shape_cast %75 : vector<8x256xf32> to vector<1x8x256xf32>
    tpu.vector_store %arg4[%76, %c0_36, %c0_37], %79 {strides = array<i32>} : memref<1x8x256xf32, #tpu.memory_space<vmem>>, vector<1x8x256xf32>,
    %c1_i32 = arith.constant 1 : i32
    return
  }
  func.func @transform_0(%arg0: i32) -> (i32, i32, i32) {
    %c0_i32 = arith.constant 0 : i32
    %c0_i32_0 = arith.constant 0 : i32
    %c0_i32_1 = arith.constant 0 : i32
    return %arg0, %c0_i32, %c0_i32_0 : i32, i32, i32
  }
  func.func @transform_1(%arg0: i32) -> (i32, i32, i32) {
    %c0_i32 = arith.constant 0 : i32
    %c0_i32_0 = arith.constant 0 : i32
    %c0_i32_1 = arith.constant 0 : i32
    return %arg0, %c0_i32, %c0_i32_0 : i32, i32, i32
  }
  func.func @transform_2(%arg0: i32) -> (i32, i32) {
    %c0_i32 = arith.constant 0 : i32
    %c0_i32_0 = arith.constant 0 : i32
    %c0_i32_1 = arith.constant 0 : i32
    return %c0_i32, %c0_i32_0 : i32, i32
  }
  func.func @transform_3(%arg0: i32) -> (i32, i32, i32) {
    %c0_i32 = arith.constant 0 : i32
    %c0_i32_0 = arith.constant 0 : i32
    %c0_i32_1 = arith.constant 0 : i32
    return %arg0, %c0_i32, %c0_i32_0 : i32, i32, i32
  }
}

</mosaic_0001>

<bundles_post_ra>
// kernel: sto_conv2d_forward.1
= control target key start
LH: loop header
LB: loop body
LE: loop exit
PB: predicated region body
PF: predicated region fallthrough
CT: control target
= control target key end

     0   :  { %s855_s12 = smov 0   ;;  %s968_s0 = inlined_call_operand.vmem [shape: f32[2,4,432], index: 0, kind: input, shape index: {}]   ;;  %s969_s1 = inlined_call_operand.vmem [shape: f32[2,4,9], index: 1, kind: input, shape index: {}]   ;;  %s970_s2 = inlined_call_operand.vmem [shape: f32[8,40], index: 2, kind: input, shape index: {}]   ;;  %s971_s3 = inlined_call_operand.vmem [shape: f32[2,8,256], index: 3, kind: output, shape index: {}]  }
   0x1 LB: > { %s750_s13 = sadd.s32 4294967295, %s813_s12   ;;  %p754_p0 = scmp.ge.s32.totalorder %s813_s12, 1  ;;  %s813_s12 = sphi %s855_s12, %s13_s12  }
   0x2   : > { %p146_p1 = scmp.lt.s32.totalorder %s813_s12, 3 }
   0x4   : > { %p147_p2 = pnand %p754_p0, %p146_p1 }
   0x5   : > { %p174_p3 = scmp.lt.s32.totalorder (!%p147_p2), %s750_s13, 1  ;;  %s825_s22 = smov (!%p147_p2), 127  }
   0x6   : > { %150 = sbr.rel (%p147_p2) target bundleno = 670 (0x29e), region = 32  ;;  %s826_s23 = smov (!%p147_p2), 126  }
   0x7   : > { %s827_s24 = smov (!%p147_p2), 110   ;;  %s828_s25 = smov (!%p147_p2), 109  }
   0x8   : > { %s829_s26 = smov (!%p147_p2), 108   ;;  %s830_s27 = smov (!%p147_p2), 92  }
   0x9   : > { %s831_s28 = smov (!%p147_p2), 91   ;;  %s832_s29 = smov (!%p147_p2), 90  }
   0xb   : > { %v815_v0 = vmov 1   ;;  %v816_v1 = vmov 3   ;;  %s973_s13 = smov (!%p174_p3, %s750_s13), 1  ;;  %v817_v3 = vmov 2   ;;  %v818_v4 = vmov 4  }
   0xc   : > { %793 = vset.pattern.permute.xlu0 %v815_v0  ;;  %795 = vset.pattern.permute.xlu1 %v816_v1  ;;  %s757_s14 = sshll.u32 %s973_s13, 2  ;;  %v819_v5 = vmov 5   ;;  %v820_v6 = vmov 6   ;;  %v821_v7 = vmov 7   ;;  %v822_v8 = vmov 0   ;;  %s763_s18 = sshll.u32 %s973_s13, 4 }
   0xd   : > { %s182_s17 = scalar_lea.vmem %s969_s1, %s757_s14  ;;  %v823_v9 = vmov 8   ;;  %v188_v10 = vlaneseq  ;;  %v824_v11 = vmov 839922192   ;;  %s178_s21 = scalar_lea.vmem %s968_s0, %s763_s18  ;;  %vm235_vm0 = vcmask 1043456  }
   0xe   : > { %v199_v2 = vld [vmem:[%s182_s17] sm:$0xf]  ;;  %v205_v12 = vunpack.c.l.s4 %v824_v11  ;;  %v198_v21 = vld [vmem:[%s178_s21 + $0x8] sm:$0xff]  ;;  %vm237_vm1 = vcmask 1039360   ;;  %vm266_vm2 = vcmask 1031168   ;;  %vm295_vm3 = vcmask 900096   ;;  %s187_s7 = scalar_lea.vmem %s971_s3, %s763_s18 }
   0xf   : > { %215 = vperm.xlu0 %793, %v199_v2   ;;  %274 = vperm.xlu1 %795, %v199_v2   ;;  %v208_v14 = vshrl.u32 %v188_v10, 7  ;;  %v197_v17 = vld [vmem:[%s178_s21] sm:$0xff]  ;;  %vm324_vm4 = vcmask 891904   ;;  %vm353_vm5 = vcmask 883712   ;;  %vm382_vm6 = vcmask 752640  }
  0x10   : > { %v206_v13 = vunpack.c.0.s8 %v205_v12  ;;  %vm411_vm7 = vcmask 744448   ;;  %vm440_vm8 = vcmask 736256   ;;  %vm190_vm9 = vcmp.lt.s32.totalorder %v188_v10, 256 }
  0x11   : > { %vm606_vm10 = vcmask 326656  }
  0x12   : > { %v209_v15 = vsub.s32 %v206_v13, %v208_v14 }
  0x13   : > { %794 = vset.pattern.permute.xlu0 %v817_v3  ;;  %796 = vset.pattern.permute.xlu1 %v818_v4 }
  0x14   : > { %245 = vperm.xlu0 %794, %v199_v2   ;;  %303 = vperm.xlu1 %796, %v199_v2  }
  0x18   : > { %797 = vset.pattern.permute.xlu1 %v819_v5  ;;  %798 = vset.pattern.permute.xlu0 %v820_v6 }
  0x19   : > { %332 = vperm.xlu1 %797, %v199_v2   ;;  %361 = vperm.xlu0 %798, %v199_v2  }
  0x1d   : > { %799 = vset.pattern.permute.xlu1 %v821_v7  ;;  %801 = vset.pattern.permute.xlu0 %v822_v8 }
  0x1e   : > { %390 = vperm.xlu1 %799, %v199_v2   ;;  %202 = vperm.xlu0 %801, %v199_v2  }
  0x22   : > { %800 = vset.pattern.permute.xlu1 %v823_v9  ;;  %802 = vset.pattern.permute.xlu0 %v823_v9 }
  0x23   : > { %419 = vperm.xlu1 %800, %v199_v2  }
  0x8a   : > { %v216_v16 = vpop.permute.xlu0 %215  ;;  %v275_v18 = vpop.permute.xlu1 %274 }
  0x8b   : > { %v223_v19 = vrot.slane %v216_v16, %v209_v15  ;;  %v282_v25 = vrot.slane %v275_v18, %v209_v15 }
  0x8d   : > { %v225_v20 = vmul.f32 %v223_v19, %v197_v17  ;;  %v226_v26 = vmul.f32 %v223_v19, %v198_v21  ;;  %v284_v29 = vmul.f32 %v282_v25, %v197_v17  ;;  %v285_v35 = vmul.f32 %v282_v25, %v198_v21 }
  0x8f   : > { %229 = vrot.lane.b32.xlu1 %v225_v20, %s825_s22  ;;  %v246_v22 = vpop.permute.xlu0 %245  ;;  %v304_v23 = vpop.permute.xlu1 %303 }
  0x90   : > { %v253_v24 = vrot.slane %v246_v22, %v209_v15  ;;  %v311_v30 = vrot.slane %v304_v23, %v209_v15 }
  0x92   : > { %v255_v27 = vmul.f32 %v253_v24, %v197_v17  ;;  %v256_v28 = vmul.f32 %v253_v24, %v198_v21  ;;  %v313_v33 = vmul.f32 %v311_v30, %v197_v17  ;;  %v314_v38 = vmul.f32 %v311_v30, %v198_v21 }
  0x93   : > { %231 = vrot.lane.b32.xlu1 %v226_v26, %s825_s22 }
  0x94   : > { %259 = vrot.lane.b32.xlu0 %v255_v27, %s826_s23  ;;  %v333_v31 = vpop.permute.xlu1 %332  ;;  %v362_v32 = vpop.permute.xlu0 %361 }
  0x95   : > { %v340_v34 = vrot.slane %v333_v31, %v209_v15  ;;  %v369_v41 = vrot.slane %v362_v32, %v209_v15 }
  0x97   : > { %261 = vrot.lane.b32.xlu1 %v256_v28, %s826_s23  ;;  %v342_v40 = vmul.f32 %v340_v34, %v197_v17  ;;  %v343_v44 = vmul.f32 %v340_v34, %v198_v21  ;;  %v371_v45 = vmul.f32 %v369_v41, %v197_v17  ;;  %v372_v48 = vmul.f32 %v369_v41, %v198_v21 }
  0x98   : > { %288 = vrot.lane.b32.xlu0 %v284_v29, %s827_s24 }
  0x99   : > { %v203_v36 = vpop.permute.xlu0 %202  ;;  %v391_v39 = vpop.permute.xlu1 %390 }
  0x9a   : > { %v210_v37 = vrot.slane %v203_v36, %v209_v15  ;;  %v398_v46 = vrot.slane %v391_v39, %v209_v15 }
  0x9b   : > { %290 = vrot.lane.b32.xlu1 %v285_v35, %s827_s24 }
  0x9c   : > { %317 = vrot.lane.b32.xlu0 %v313_v33, %s828_s25  ;;  %v212_v42 = vmul.f32 %v210_v37, %v197_v17  ;;  %v213_v43 = vmul.f32 %v210_v37, %v198_v21  ;;  %v400_v49 = vmul.f32 %v398_v46, %v197_v17  ;;  %v401_v51 = vmul.f32 %v398_v46, %v198_v21 }
  0x9e   : > { %v420_v47 = vpop.permute.xlu1 %419 }
  0x9f   : > { %319 = vrot.lane.b32.xlu1 %v314_v38, %s828_s25  ;;  %v427_v50 = vrot.slane %v420_v47, %v209_v15 }
  0xa0   : > { %346 = vrot.lane.b32.xlu0 %v342_v40, %s829_s26 }
  0xa1   : > { %v429_v52 = vmul.f32 %v427_v50, %v197_v17  ;;  %v430_v53 = vmul.f32 %v427_v50, %v198_v21 }
  0xa3   : > { %348 = vrot.lane.b32.xlu1 %v343_v44, %s829_s26 }
  0xa4   : > { %375 = vrot.lane.b32.xlu0 %v371_v45, %s830_s27 }
  0xa7   : > { %377 = vrot.lane.b32.xlu1 %v372_v48, %s830_s27 }
  0xa8   : > { %404 = vrot.lane.b32.xlu0 %v400_v49, %s831_s28 }
  0xab   : > { %406 = vrot.lane.b32.xlu1 %v401_v51, %s831_s28 }
  0xac   : > { %433 = vrot.lane.b32.xlu0 %v429_v52, %s832_s29 }
  0xaf   : > { %435 = vrot.lane.b32.xlu1 %v430_v53, %s832_s29 }
 0x101   : > { %v230_v54 = vpop.permute.xlu1 %229 }
 0x102   : > { %v233_v62 = vrot.slane %v230_v54, 4 }
 0x105   : > { %v232_v55 = vpop.permute.xlu1 %231 }
 0x106   : > { %v260_v56 = vpop.permute.xlu0 %259  ;;  %v234_v60 = vrot.slane %v232_v55, 4 }
 0x107   : > { %v263_v63 = vrot.slane %v260_v56, 4 }
 0x108   : > { %v236_v2 = vsel %vm235_vm0, %v233_v62, %v234_v60  ;;  %v239_v5 = vsel %vm237_vm1, %v232_v55, %v234_v60 }
 0x109   : > { %v262_v57 = vpop.permute.xlu1 %261  ;;  %v238_v11 = vsel %vm237_vm1, %v230_v54, %v236_v2  ;;  %v243_v18 = vadd.f32 %v239_v5, %v213_v43 }
 0x10a   : > { %v289_v58 = vpop.permute.xlu0 %288  ;;  %v264_v0 = vrot.slane %v262_v57, 4  ;;  %v242_v20 = vadd.f32 %v238_v11, %v212_v42 }
 0x10b   : > { %v292_v7 = vrot.slane %v289_v58, 4 }
 0x10c   : > { %v265_v6 = vsel %vm235_vm0, %v263_v63, %v264_v0  ;;  %v268_v13 = vsel %vm266_vm2, %v262_v57, %v264_v0 }
 0x10d   : > { %v291_v59 = vpop.permute.xlu1 %290  ;;  %v267_v19 = vsel %vm266_vm2, %v260_v56, %v265_v6  ;;  %v272_v24 = vadd.f32 %v268_v13, %v243_v18  ;;  %v833_v6 = vmov 1.0  }
 0x10e   : > { %v318_v61 = vpop.permute.xlu0 %317  ;;  %v293_v3 = vrot.slane %v291_v59, 4  ;;  %v271_v27 = vadd.f32 %v267_v19, %v242_v20  ;;  %193 = vst.msk [vmem:[#allocation3 + $0x44] ss:$8 sm:$0x3] %vm190_vm9, %v833_v6 }
 0x10f   : > { %v321_v8 = vrot.slane %v318_v61, 4 }
 0x110   : > { %v294_v14 = vsel %vm235_vm0, %v292_v7, %v293_v3  ;;  %v297_v21 = vsel %vm295_vm3, %v291_v59, %v293_v3  ;;  %v834_v7 = vmov 0.0  }
 0x111   : > { %v320_v1 = vpop.permute.xlu1 %319  ;;  %v296_v25 = vsel %vm295_vm3, %v289_v58, %v294_v14  ;;  %v301_v32 = vadd.f32 %v297_v21, %v272_v24  ;;  %196 = vst [vmem:[#allocation3 + $0x48] sm:$0xe0] %v834_v7  ;;  %195 = vst [vmem:[#allocation3 + $0x40] sm:$0xe0] %v834_v7  ;;  %674 = vmatprep.mubr.f32.mxu0 %v834_v7 }
 0x112   : > { %v347_v4 = vpop.permute.xlu0 %346  ;;  %v322_v9 = vrot.slane %v320_v1, 4  ;;  %v300_v34 = vadd.f32 %v296_v25, %v271_v27 }
 0x113   : > { %v350_v15 = vrot.slane %v347_v4, 4 }
 0x114   : > { %v323_v22 = vsel %vm235_vm0, %v321_v8, %v322_v9  ;;  %v326_v28 = vsel %vm324_vm4, %v320_v1, %v322_v9 }
 0x115   : > { %v349_v12 = vpop.permute.xlu1 %348  ;;  %v325_v33 = vsel %vm324_vm4, %v318_v61, %v323_v22  ;;  %v330_v38 = vadd.f32 %v326_v28, %v301_v32 }
 0x116   : > { %v351_v16 = vrot.slane %v349_v12, 4  ;;  %v376_v17 = vpop.permute.xlu0 %375  ;;  %v329_v41 = vadd.f32 %v325_v33, %v300_v34 }
 0x117   : > { %v379_v23 = vrot.slane %v376_v17, 4 }
 0x118   : > { %v352_v29 = vsel %vm235_vm0, %v350_v15, %v351_v16  ;;  %v355_v35 = vsel %vm353_vm5, %v349_v12, %v351_v16 }
 0x119   : > { %v378_v26 = vpop.permute.xlu1 %377  ;;  %v354_v39 = vsel %vm353_vm5, %v347_v4, %v352_v29  ;;  %v359_v45 = vadd.f32 %v355_v35, %v330_v38 }
 0x11a   : > { %v380_v30 = vrot.slane %v378_v26, 4  ;;  %v405_v31 = vpop.permute.xlu0 %404  ;;  %v358_v47 = vadd.f32 %v354_v39, %v329_v41 }
 0x11b   : > { %v408_v37 = vrot.slane %v405_v31, 4 }
 0x11c   : > { %v381_v36 = vsel %vm235_vm0, %v379_v23, %v380_v30  ;;  %v384_v42 = vsel %vm382_vm6, %v378_v26, %v380_v30 }
 0x11d   : > { %v407_v40 = vpop.permute.xlu1 %406  ;;  %v383_v46 = vsel %vm382_vm6, %v376_v17, %v381_v36  ;;  %v388_v51 = vadd.f32 %v384_v42, %v359_v45 }
 0x11e   : > { %v409_v43 = vrot.slane %v407_v40, 4  ;;  %v434_v44 = vpop.permute.xlu0 %433  ;;  %v387_v54 = vadd.f32 %v383_v46, %v358_v47 }
 0x11f   : > { %v437_v50 = vrot.slane %v434_v44, 4 }
 0x120   : > { %v410_v48 = vsel %vm235_vm0, %v408_v37, %v409_v43  ;;  %v413_v49 = vsel %vm411_vm7, %v407_v40, %v409_v43 }
 0x121   : > { %v412_v52 = vsel %vm411_vm7, %v405_v31, %v410_v48  ;;  %v436_v53 = vpop.permute.xlu1 %435  ;;  %v417_v56 = vadd.f32 %v413_v49, %v388_v51 }
 0x122   : > { %v438_v55 = vrot.slane %v436_v53, 4  ;;  %v416_v57 = vadd.f32 %v412_v52, %v387_v54 }
 0x124   : > { %v439_v58 = vsel %vm235_vm0, %v437_v50, %v438_v55  ;;  %v442_v59 = vsel %vm440_vm8, %v436_v53, %v438_v55 }
 0x125   : > { %v441_v60 = vsel %vm440_vm8, %v434_v44, %v439_v58  ;;  %v446_v61 = vadd.f32 %v442_v59, %v417_v56 }
 0x126   : > { %v445_v62 = vadd.f32 %v441_v60, %v416_v57 }
 0x127   : > { %448 = vst [vmem:[#allocation2 + $0x8] sm:$0xf] %v446_v61  ;;  %v595_v61 = vld [vmem:[%s970_s2] sm:$0xff] }
 0x128   : > { %v547_v63 = vcombine.high %v445_v62, %v445_v62  ;;  %453 = vst [vmem:[#allocation3] sm:$0xf] %v445_v62  ;;  %v564_v10 = vcombine.low %v445_v62, %v445_v62 }
 0x12a   : > { %454 = vst [vmem:[#allocation3 + $0x8] sm:$0xf] %v547_v63 }
 0x12e   : > { %v579_v0 = vld [vmem:[#allocation2 + $0x8] sm:$0xf] }
 0x12f   : > { %v544_v1 = vld [vmem:[#allocation2 + $0x8] sm:$0xf]  ;;  %587 = vrot.lane.b32.xlu1 %v579_v0, %s832_s29 }
 0x130   : > { %552 = vrot.lane.b32.xlu0 %v544_v1, %s830_s27  ;;  %v509_v2 = vld [vmem:[#allocation2 + $0x8] sm:$0xf] }
 0x131   : > { %v474_v3 = vld [vmem:[#allocation2 + $0x8] sm:$0xf] }
 0x132   : > { %v803_v4 = vld [vmem:[#allocation2 + $0x8] ss:$0 sps:$4 sm:$0xff]  }
 0x133   : > { %568 = vrot.lane.b32.xlu1 %v445_v62, %s831_s28  ;;  %v804_v5 = vld [vmem:[#allocation2 + $0x8] ss:$0 sps:$4 sm:$0xff]  }
 0x134   : > { %517 = vrot.lane.b32.xlu0 %v509_v2, %s828_s25  ;;  %v805_v8 = vld [vmem:[#allocation2 + $0x8] ss:$0 sps:$4 sm:$0xff]  }
 0x135   : > { %v806_v9 = vld [vmem:[#allocation2 + $0x8] ss:$0 sps:$4 sm:$0xff]  }
 0x137   : > { %548 = vrot.lane.b32.xlu1 %v445_v62, %s830_s27 }
 0x138   : > { %482 = vrot.lane.b32.xlu0 %v474_v3, %s826_s23 }
 0x13b   : > { %533 = vrot.lane.b32.xlu1 %v445_v62, %s829_s26 }
 0x13c   : > { %583 = vrot.lane.b32.xlu0 %v445_v62, %s832_s29 }
 0x13f   : > { %513 = vrot.lane.b32.xlu1 %v445_v62, %s828_s25 }
 0x140   : > { %570 = vrot.lane.b32.xlu0 %v803_v4, %s831_s28 }
 0x143   : > { %498 = vrot.lane.b32.xlu1 %v445_v62, %s827_s24 }
 0x144   : > { %535 = vrot.lane.b32.xlu0 %v804_v5, %s829_s26 }
 0x147   : > { %478 = vrot.lane.b32.xlu1 %v445_v62, %s826_s23 }
 0x148   : > { %500 = vrot.lane.b32.xlu0 %v805_v8, %s827_s24 }
 0x14b   : > { %463 = vrot.lane.b32.xlu1 %v445_v62, %s825_s22 }
 0x14c   : > { %585 = vrot.lane.b32.xlu0 %v547_v63, %s832_s29 }
 0x14f   : > { %550 = vrot.lane.b32.xlu1 %v547_v63, %s830_s27 }
 0x150   : > { %566 = vrot.lane.b32.xlu0 %v564_v10, %s831_s28 }
 0x153   : > { %515 = vrot.lane.b32.xlu1 %v547_v63, %s828_s25 }
 0x154   : > { %531 = vrot.lane.b32.xlu0 %v564_v10, %s829_s26 }
 0x157   : > { %480 = vrot.lane.b32.xlu1 %v547_v63, %s826_s23 }
 0x158   : > { %496 = vrot.lane.b32.xlu0 %v564_v10, %s827_s24 }
 0x15b   : > { %461 = vrot.lane.b32.xlu1 %v564_v10, %s825_s22 }
 0x15c   : > { %465 = vrot.lane.b32.xlu0 %v806_v9, %s825_s22 }
 0x1a1   : > { %v588_v11 = vpop.permute.xlu1 %587 }
 0x1a2   : > { %v553_v12 = vpop.permute.xlu0 %552 }
 0x1a5   : > { %v569_v14 = vpop.permute.xlu1 %568 }
 0x1a6   : > { %v518_v13 = vpop.permute.xlu0 %517 }
 0x1a9   : > { %v549_v16 = vpop.permute.xlu1 %548 }
 0x1aa   : > { %v483_v15 = vpop.permute.xlu0 %482 }
 0x1ad   : > { %v534_v18 = vpop.permute.xlu1 %533 }
 0x1ae   : > { %v584_v17 = vpop.permute.xlu0 %583 }
 0x1b1   : > { %v514_v20 = vpop.permute.xlu1 %513 }
 0x1b2   : > { %v571_v19 = vpop.permute.xlu0 %570 }
 0x1b3   : > { %v573_v21 = vsel %vm411_vm7, %v569_v14, %v571_v19 }
 0x1b4   : > { %577 = vst [vmem:[#allocation3 + $0x38] sm:$0xf0] %v573_v21 }
 0x1b5   : > { %v499_v23 = vpop.permute.xlu1 %498 }
 0x1b6   : > { %v536_v22 = vpop.permute.xlu0 %535 }
 0x1b7   : > { %v538_v24 = vsel %vm353_vm5, %v534_v18, %v536_v22 }
 0x1b8   : > { %542 = vst [vmem:[#allocation3 + $0x28] sm:$0xf0] %v538_v24 }
 0x1b9   : > { %v479_v26 = vpop.permute.xlu1 %478 }
 0x1ba   : > { %v501_v25 = vpop.permute.xlu0 %500 }
 0x1bb   : > { %v503_v27 = vsel %vm295_vm3, %v499_v23, %v501_v25 }
 0x1bc   : > { %507 = vst [vmem:[#allocation3 + $0x18] sm:$0xf0] %v503_v27 }
 0x1bd   : > { %v464_v29 = vpop.permute.xlu1 %463 }
 0x1be   : > { %v586_v28 = vpop.permute.xlu0 %585 }
 0x1bf   : > { %v589_v30 = vsel %vm440_vm8, %v584_v17, %v586_v28  ;;  %v590_v31 = vsel %vm440_vm8, %v586_v28, %v588_v11 }
 0x1c0   : > { %593 = vst [vmem:[#allocation3 + $0x40] sm:$0xf] %v589_v30  ;;  %594 = vst [vmem:[#allocation3 + $0x48] sm:$0xf] %v590_v31 }
 0x1c1   : > { %v551_v33 = vpop.permute.xlu1 %550 }
 0x1c2   : > { %v567_v32 = vpop.permute.xlu0 %566  ;;  %v554_v35 = vsel %vm382_vm6, %v549_v16, %v551_v33  ;;  %v555_v36 = vsel %vm382_vm6, %v551_v33, %v553_v12 }
 0x1c3   : > { %v572_v34 = vsel %vm411_vm7, %v567_v32, %v569_v14  ;;  %558 = vst [vmem:[#allocation3 + $0x30] sm:$0xf] %v554_v35  ;;  %559 = vst [vmem:[#allocation3 + $0x38] sm:$0xf] %v555_v36 }
 0x1c4   : > { %576 = vst [vmem:[#allocation3 + $0x30] sm:$0xf0] %v572_v34 }
 0x1c5   : > { %v516_v38 = vpop.permute.xlu1 %515 }
 0x1c6   : > { %v532_v37 = vpop.permute.xlu0 %531  ;;  %v519_v40 = vsel %vm324_vm4, %v514_v20, %v516_v38  ;;  %v520_v41 = vsel %vm324_vm4, %v516_v38, %v518_v13 }
 0x1c7   : > { %v537_v39 = vsel %vm353_vm5, %v532_v37, %v534_v18  ;;  %v605_v42 = vld [vmem:[#allocation3 + $0x48] sm:$0xff]  ;;  %v604_v43 = vld [vmem:[#allocation3 + $0x40] sm:$0xff]  ;;  %523 = vst [vmem:[#allocation3 + $0x20] sm:$0xf] %v519_v40  ;;  %524 = vst [vmem:[#allocation3 + $0x28] sm:$0xf] %v520_v41 }
 0x1c8   : > { %541 = vst [vmem:[#allocation3 + $0x20] sm:$0xf0] %v537_v39  ;;  %632 = vmatprep.subr.mxu0 %v605_v42 }
 0x1c9   : > { %633 = vmatpush1.msra.mxu0 %v604_v43  ;;  %v481_v45 = vpop.permute.xlu1 %480 }
 0x1ca   : > { %v497_v44 = vpop.permute.xlu0 %496  ;;  %v484_v47 = vsel %vm266_vm2, %v479_v26, %v481_v45  ;;  %v485_v48 = vsel %vm266_vm2, %v481_v45, %v483_v15  ;;  %v603_v49 = vld [vmem:[#allocation3 + $0x38] sm:$0xff] }
 0x1cb   : > { %v502_v46 = vsel %vm295_vm3, %v497_v44, %v499_v23  ;;  %v602_v50 = vld [vmem:[#allocation3 + $0x30] sm:$0xff]  ;;  %488 = vst [vmem:[#allocation3 + $0x10] sm:$0xf] %v484_v47  ;;  %489 = vst [vmem:[#allocation3 + $0x18] sm:$0xf] %v485_v48  ;;  %634 = vmatprep.subr.mxu0 %v603_v49 }
 0x1cc   : > { %506 = vst [vmem:[#allocation3 + $0x10] sm:$0xf0] %v502_v46  ;;  %635 = vmatpush1.msra.mxu0 %v602_v50 }
 0x1cd   : > { %v462_v52 = vpop.permute.xlu1 %461 }
 0x1ce   : > { %v466_v51 = vpop.permute.xlu0 %465  ;;  %v467_v54 = vsel %vm237_vm1, %v462_v52, %v464_v29  ;;  %v601_v55 = vld [vmem:[#allocation3 + $0x28] sm:$0xff] }
 0x1cf   : > { %v468_v53 = vsel %vm237_vm1, %v464_v29, %v466_v51  ;;  %v600_v56 = vld [vmem:[#allocation3 + $0x20] sm:$0xff]  ;;  %471 = vst [vmem:[#allocation3] sm:$0xf0] %v467_v54  ;;  %636 = vmatprep.subr.mxu0 %v601_v55 }
 0x1d0   : > { %472 = vst [vmem:[#allocation3 + $0x8] sm:$0xf0] %v468_v53  ;;  %637 = vmatpush1.msra.mxu0 %v600_v56 }
 0x1d2   : > { %v599_v57 = vld [vmem:[#allocation3 + $0x18] sm:$0xff] }
 0x1d3   : > { %v598_v58 = vld [vmem:[#allocation3 + $0x10] sm:$0xff]  ;;  %638 = vmatprep.subr.mxu0 %v599_v57 }
 0x1d4   : > { %639 = vmatpush1.msra.mxu0 %v598_v58 }
 0x1d6   : > { %v596_v60 = vld [vmem:[#allocation3] sm:$0xff] }
 0x1d7   : > { %v597_v59 = vld [vmem:[#allocation3 + $0x8] sm:$0xff] }
 0x1d8   : > { %640 = vmatprep.subr.mxu0 %v597_v59 }
 0x1d9   : > { %641 = vmatpush1.msra.mxu0 %v596_v60 }
 0x1da   : > { %760 = vmatmul.mubr.msk.f32.vlgmr.msra.gmra.mxu0 %vm606_vm10, %v595_v61 }
 0x29a   : > { %v676_v62 = vpop.f32.mrf.mxu0 }
 0x29b   : > { %681 = vst [vmem:[%s187_s7] sm:$0xff] %v676_v62 }
 0x29c   : > { %v678_v63 = vpop.f32.mrf.mxu0 }
 0x29d   : > { %682 = vst [vmem:[%s187_s7 + $0x8] sm:$0xff] %v678_v63 }
 0x29e PF: > { %s13_s12 = sadd.s32 1, %s813_s12  }
 0x29f   : > { %p10_p4 = scmp.ge.s32.totalorder %s13_s12, 4  }
 0x2a1   :  { %12 = sbr.rel (!%p10_p4) target bundleno = 1 (0x1), region = 66 }

</bundles_post_ra>
